<compile_context>
chip_gen: v7x
topology: tpu7x:2x2x1
jax: 0.10.0
libtpu: 0.0.40
codegen_flags: <defaults>
</compile_context>

<pallas_src>
import functools

import jax
import jax.numpy as jnp
from jax.experimental import pallas as pl
from jax.experimental.pallas import tpu as pltpu


def _round_up(v, m):
    return (v + m - 1) // m * m


def _label_smoothing_kernel(x_ref, t_ref, loss_ref, *,
                            confidence, smoothing, n_classes):
    # x_ref: (tile_n, C) logits; t_ref: (tile_n, 1) int32; loss_ref: (tile_n, 1) f32.
    x = x_ref[...].astype(jnp.float32)
    t = t_ref[...]

    # Stable log-sum-exp along the class (lane) axis.
    row_max = jnp.max(x, axis=-1, keepdims=True)
    shifted = x - row_max
    lse = jnp.log(jnp.sum(jnp.exp(shifted), axis=-1, keepdims=True))

    # Fused smoothed-NLL (confidence + smoothing == 1):
    #   loss = conf*(lse - shifted[target]) + smoothing*(lse - mean(shifted))
    #        = lse - sum_c (conf*onehot_c + smoothing/C) * shifted_c
    # One weighted lane reduction; logprobs never materialized. The VPU work
    # here (iota/compare/select/mul) is filler hidden under the block DMA.
    # TODO(synk): no ignore_index / out-of-range target handling (matches the
    # original module, which has none).
    uniform = jnp.float32(smoothing / n_classes)
    cls_idx = jax.lax.broadcasted_iota(jnp.int32, x.shape, 1)
    w = jnp.where(cls_idx == t, jnp.float32(confidence) + uniform, uniform)
    loss_ref[...] = lse - jnp.sum(w * shifted, axis=-1, keepdims=True)


def _vmem_capacity_bytes():
    # Per-generation physical VMEM (v5e/v6e: 128 MiB, v7x: 64 MiB per TC).
    # Fall back to the smallest (v7x) figure if the query is unavailable.
    try:
        return int(pltpu.get_tpu_info().vmem_capacity_bytes)
    except Exception:
        return 64 * 1024 * 1024


def label_smoothing_loss(x, target, smoothing=0.0, *, tile_n=None):
    """x: [N, C] float logits (f32 or bf16), target: [N] int class indices.

    Returns the scalar smoothed-NLL loss (mean over the batch), matching
    torch LabelSmoothing.forward.
    """
    N, C = x.shape
    confidence = 1.0 - smoothing
    itemsize = jnp.dtype(x.dtype).itemsize

    # VMEM bytes per tile row:
    #   2 * C * itemsize  -- double-buffered x block
    #   3 * C * 4         -- in-kernel full-tile f32 temporaries (shifted/w/exp)
    #   ~16               -- target + per-row-loss blocks (double-buffered)
    bytes_per_row = 2 * C * itemsize + 3 * C * 4 + 16

    if tile_n is None:
        vmem_cap = _vmem_capacity_bytes()
        tile_budget = vmem_cap // 2           # x blocks + temporaries budget
        block_target = 8 * 1024 * 1024        # ~8 MiB x blocks keep the
                                              # ~0.35 us/step overhead small
        tile_from_vmem = (tile_budget // bytes_per_row) // 8 * 8
        tile_from_block = (block_target // (C * itemsize)) // 8 * 8
        max_tile = max(8, min(tile_from_vmem, tile_from_block))

        num_tiles = pl.cdiv(N, max_tile)
        # Keep >= 2 grid steps when there are enough rows so the "parallel"
        # grid axis can be split across v7x's two TensorCores (no-op on
        # single-TC v5e/v6e).
        if num_tiles < 2 and N >= 16:
            num_tiles = 2
        # Spread rows evenly over tiles to minimize tail waste.
        tile_n = min(max_tile, max(8, _round_up(pl.cdiv(N, num_tiles), 8)))
    else:
        tile_n = max(8, _round_up(int(tile_n), 8))

    num_tiles = pl.cdiv(N, tile_n)

    # No padding of x (and none of target): partial tail block handled by
    # Pallas OOB block semantics; rows >= N are never written back.
    t2d = target.astype(jnp.int32).reshape(N, 1)

    kernel = functools.partial(
        _label_smoothing_kernel,
        confidence=confidence, smoothing=smoothing, n_classes=C)

    # Scoped-VMEM limit sized from the actual per-tile need, capped below
    # physical VMEM with headroom.
    vmem_need = tile_n * bytes_per_row + (1 << 20)
    vmem_limit = int(min(_vmem_capacity_bytes() - (8 << 20),
                         max(vmem_need, 16 << 20)))

    cost = pl.CostEstimate(
        flops=8 * N * C,
        transcendentals=N * C,
        bytes_accessed=N * C * itemsize + N * 4 + N * 4)

    per_row = pl.pallas_call(
        kernel,
        out_shape=jax.ShapeDtypeStruct((N, 1), jnp.float32),
        grid_spec=pltpu.PrefetchScalarGridSpec(
            num_scalar_prefetch=0,
            grid=(num_tiles,),
            in_specs=[
                pl.BlockSpec((tile_n, C), lambda i: (i, 0)),
                pl.BlockSpec((tile_n, 1), lambda i: (i, 0)),
            ],
            out_specs=pl.BlockSpec((tile_n, 1), lambda i: (i, 0)),
        ),
        compiler_params=pltpu.CompilerParams(
            dimension_semantics=("parallel",),
            vmem_limit_bytes=vmem_limit),
        cost_estimate=cost,
    )(x, t2d)

    # Batch mean over the N valid rows (tiny reduction; done outside the
    # kernel so the grid axis stays fully parallel / megacore-friendly).
    return jnp.sum(per_row[:, 0]) / jnp.float32(N)


def _reference(x, target, smoothing):
    confidence = 1.0 - smoothing
    logprobs = jax.nn.log_softmax(x, axis=-1)
    nll = -jnp.take_along_axis(logprobs, target[:, None], axis=-1)[:, 0]
    smooth = -jnp.mean(logprobs, axis=-1)
    return jnp.mean(confidence * nll + smoothing * smooth)


if __name__ == "__main__":
    key = jax.random.PRNGKey(0)

    # Case 1: divisible N, f32, with smoothing.
    kx, kt = jax.random.split(key)
    N, C = 16, 128
    smoothing = 0.1
    x = jax.random.normal(kx, (N, C), dtype=jnp.float32)
    target = jax.random.randint(kt, (N,), 0, C, dtype=jnp.int32)
    loss = jax.block_until_ready(label_smoothing_loss(x, target, smoothing=smoothing))
    ref = _reference(x, target, smoothing)
    assert jnp.allclose(loss, ref, rtol=1e-5, atol=1e-5), (loss, ref)

    # Case 2: non-divisible N (exercises the un-padded partial tail block) and
    # smoothing=0.0.
    kx2, kt2 = jax.random.split(jax.random.PRNGKey(1))
    N2, C2 = 20, 256
    x2 = jax.random.normal(kx2, (N2, C2), dtype=jnp.float32)
    target2 = jax.random.randint(kt2, (N2,), 0, C2, dtype=jnp.int32)
    loss2 = jax.block_until_ready(label_smoothing_loss(x2, target2, smoothing=0.0))
    ref2 = _reference(x2, target2, 0.0)
    assert jnp.allclose(loss2, ref2, rtol=1e-5, atol=1e-5), (loss2, ref2)

    # Case 3: bf16 logits (half the HBM read), non-divisible N, with smoothing.
    kx3, kt3 = jax.random.split(jax.random.PRNGKey(2))
    N3, C3 = 20, 128
    x3 = jax.random.normal(kx3, (N3, C3), dtype=jnp.float32).astype(jnp.bfloat16)
    target3 = jax.random.randint(kt3, (N3,), 0, C3, dtype=jnp.int32)
    loss3 = jax.block_until_ready(label_smoothing_loss(x3, target3, smoothing=0.1))
    ref3 = _reference(x3.astype(jnp.float32), target3, 0.1)
    assert jnp.allclose(loss3, ref3, rtol=1e-5, atol=1e-5), (loss3, ref3)

    print("KERNEL_OK")
</pallas_src>

<mosaic_0001>
module attributes {stable_mosaic.version = 11 : i64} {
  func.func @_label_smoothing_kernel(%arg0: i32, %arg1: memref<8x128xf32, #tpu.memory_space<vmem>>, %arg2: memref<8x1xi32, #tpu.memory_space<vmem>>, %arg3: memref<8x1xf32, #tpu.memory_space<vmem>>) attributes {dimension_semantics = [#tpu.dimension_semantics<parallel>], iteration_bounds = array<i64: 2>, scalar_prefetch = 0 : i64, scratch_operands = 0 : i64, tpu.core_type = #tpu.core_type<tc>, window_params = [{transform_indices = @transform_0, window_bounds = array<i64: 8, 128>}, {transform_indices = @transform_1, window_bounds = array<i64: 8, 1>}, {transform_indices = @transform_2, window_bounds = array<i64: 8, 1>}]} {
    %c0 = arith.constant 0 : index
    %c0_0 = arith.constant 0 : index
    %0 = vector.load %arg1[%c0, %c0_0] : memref<8x128xf32, #tpu.memory_space<vmem>>, vector<8x128xf32>
    %c0_1 = arith.constant 0 : index
    %c0_2 = arith.constant 0 : index
    %1 = vector.load %arg2[%c0_1, %c0_2] : memref<8x1xi32, #tpu.memory_space<vmem>>, vector<8x1xi32>
    %cst = arith.constant dense<0xFF800000> : vector<8xf32>
    %2 = vector.multi_reduction <maximumf>, %0, %cst [1] : vector<8x128xf32> to vector<8xf32>
    %3 = vector.shape_cast %2 : vector<8xf32> to vector<8x1xf32>
    %4 = vector.broadcast %3 : vector<8x1xf32> to vector<8x128xf32>
    %5 = arith.subf %0, %4 : vector<8x128xf32>
    %6 = math.exp %5 : vector<8x128xf32>
    %cst_3 = arith.constant dense<0.000000e+00> : vector<8xf32>
    %7 = vector.multi_reduction <add>, %6, %cst_3 [1] : vector<8x128xf32> to vector<8xf32>
    %8 = vector.shape_cast %7 : vector<8xf32> to vector<8x1xf32>
    %9 = math.log %8 : vector<8x1xf32>
    %10 = tpu.iota {dimensions = array<i32: 1>} : vector<8x128xi32>
    %11 = vector.broadcast %1 : vector<8x1xi32> to vector<8x128xi32>
    %12 = arith.cmpi eq, %10, %11 : vector<8x128xi32>
    %cst_4 = arith.constant 0.899999976 : f32
    %cst_5 = arith.constant 7.812500e-04 : f32
    %13 = arith.addf %cst_4, %cst_5 : f32
    %cst_6 = arith.constant 7.812500e-04 : f32
    %14 = vector.broadcast %13 : f32 to vector<8x128xf32>
    %15 = vector.broadcast %cst_6 : f32 to vector<8x128xf32>
    %16 = arith.select %12, %14, %15 : vector<8x128xi1>, vector<8x128xf32>
    %17 = arith.mulf %16, %5 : vector<8x128xf32>
    %cst_7 = arith.constant dense<0.000000e+00> : vector<8xf32>
    %18 = vector.multi_reduction <add>, %17, %cst_7 [1] : vector<8x128xf32> to vector<8xf32>
    %19 = vector.shape_cast %18 : vector<8xf32> to vector<8x1xf32>
    %20 = arith.subf %9, %19 : vector<8x1xf32>
    %c0_8 = arith.constant 0 : index
    %c0_9 = arith.constant 0 : index
    %21 = vector.load %arg3[%c0_8, %c0_9] : memref<8x1xf32, #tpu.memory_space<vmem>>, vector<8x1xf32>
    tpu.vector_store %arg3[%c0_8, %c0_9], %20 {strides = array<i32>} : memref<8x1xf32, #tpu.memory_space<vmem>>, vector<8x1xf32>,
    return
  }
  func.func @transform_0(%arg0: i32) -> (i32, i32) {
    %c0_i32 = arith.constant 0 : i32
    %c0_i32_0 = arith.constant 0 : i32
    return %arg0, %c0_i32 : i32, i32
  }
  func.func @transform_1(%arg0: i32) -> (i32, i32) {
    %c0_i32 = arith.constant 0 : i32
    %c0_i32_0 = arith.constant 0 : i32
    return %arg0, %c0_i32 : i32, i32
  }
  func.func @transform_2(%arg0: i32) -> (i32, i32) {
    %c0_i32 = arith.constant 0 : i32
    %c0_i32_0 = arith.constant 0 : i32
    return %arg0, %c0_i32 : i32, i32
  }
}

</mosaic_0001>

<bundles_post_ra>
// kernel: tpu_custom_call.1
= control target key start
LH: loop header
LB: loop body
LE: loop exit
PB: predicated region body
PF: predicated region fallthrough
CT: control target
= control target key end

     0   :  { %s295_s9 = smov 0   ;;  %s320_s0 = inlined_call_operand.vmem [shape: f32[16,128], index: 0, kind: input, shape index: {}]   ;;  %s321_s1 = inlined_call_operand.vmem [shape: s32[16,1], index: 1, kind: input, shape index: {}]   ;;  %s322_s2 = inlined_call_operand.vmem [shape: f32[16,1], index: 2, kind: output, shape index: {}]  }
   0x1 LB: > { %s245_s10 = sadd.s32 4294967295, %s276_s9   ;;  %p249_p0 = scmp.ge.s32.totalorder %s276_s9, 1  ;;  %s276_s9 = sphi %s295_s9, %s12_s9  }
   0x2   : > { %p120_p1 = scmp.lt.s32.totalorder %s276_s9, 3 }
   0x4   : > { %p121_p2 = pnand %p249_p0, %p120_p1 }
   0x5   : > { %p144_p3 = scmp.lt.s32.totalorder (!%p121_p2), %s245_s10, 1  ;;  %v278_v0 = vmov (!%p121_p2), 0   ;;  %v167_v6 = vlaneseq (!%p121_p2)  ;;  %v279_v10 = vmov (!%p121_p2), 0.00078125   ;;  %vm178_vm1 = vcmask (!%p121_p2), 7168  }
   0x6   : > { %124 = sbr.rel (%p121_p2) target bundleno = 332 (0x14c), region = 28  ;;  %265 = vset.pattern.permute.xlu0 (!%p121_p2), %v278_v0 }
   0x7   : > { %v168_v7 = vand.u32 (!%p121_p2), 127, %v167_v6 }
   0xd   : > { %s324_s10 = smov (!%p144_p3, %s245_s10), 1 }
   0xe   : > { %s303_s11 = sshll.u32 %s324_s10, 3 }
   0xf   : > { %s147_s14 = scalar_lea.vmem %s320_s0, %s303_s11  ;;  %s151_s17 = scalar_lea.vmem %s321_s1, %s303_s11 }
  0x10   : > { %v156_v1 = vld [vmem:[%s147_s14] sm:$0xff]  ;;  %s155_s20 = scalar_lea.vmem %s322_s2, %s303_s11 }
  0x11   : > { %158 = vmax.xlane.f32.xlu0 %v156_v1  ;;  %v157_v2 = vld [vmem:[%s151_s17] sm:$0xff] }
  0x27   : > { %170 = vperm.xlu0 %265, %v157_v2  }
  0x9e   : > { %v159_v3 = vpop.xlane.xlu0 %158 }
  0x9f   : > { %v160_v4 = vsub.f32 %v156_v1, %v159_v3 }
  0xa1   : > { %v161_v5 = vmul.f32 1.442695, %v160_v4 }
  0xa3   : > { %266 = vpow2.f32 %v161_v5 }
  0xa6   : > { %v171_v8 = vpop.permute.xlu0 %170 }
  0xa7   : > { %vm172_vm0 = vcmp.eq.s32.totalorder %v168_v7, %v171_v8 }
  0xa8   : > { %v173_v11 = vsel %vm172_vm0, 0.9007812, %v279_v10 }
  0xa9   : > { %v174_v12 = vmul.f32 %v173_v11, %v160_v4 }
  0xad   : > { %v267_v9 = vpop.eup %266 }
  0xae   : > { %163 = vadd.xlane.f32.xlu1 %v267_v9 }
  0xb2   : > { %175 = vadd.xlane.f32.xlu1 %v174_v12 }
 0x13b   : > { %v164_v13 = vpop.xlane.xlu1 %163 }
 0x13c   : > { %268 = vlog2.f32 %v164_v13 }
 0x13f   : > { %v176_v16 = vpop.xlane.xlu1 %175 }
 0x146   : > { %v269_v14 = vpop.eup %268 }
 0x147   : > { %v166_v15 = vmul.f32 0.6931472, %v269_v14 }
 0x149   : > { %v177_v17 = vsub.f32 %v166_v15, %v176_v16 }
 0x14b   : > { %179 = vst.msk [vmem:[%s155_s20] sm:$0xff] %vm178_vm1, %v177_v17 }
 0x14c PF: > { %s12_s9 = sadd.s32 1, %s276_s9  }
 0x14d   : > { %p9_p4 = scmp.ge.s32.totalorder %s12_s9, 4  }
 0x14f   :  { %11 = sbr.rel (!%p9_p4) target bundleno = 1 (0x1), region = 61 }

</bundles_post_ra>
